<compile_context>
chip_gen: v6e
topology: v6e:2x2x1
jax: 0.10.0
libtpu: 0.0.40
codegen_flags: <defaults>
</compile_context>

<pallas_src>
import functools

import jax
import jax.numpy as jnp
from jax.experimental import pallas as pl
from jax.experimental.pallas import tpu as pltpu

_VMEM_WORKSET_BUDGET = 32 * 1024 * 1024   # per-grid-step working-set target
_VMEM_LIMIT_BYTES = 48 * 1024 * 1024      # scoped VMEM limit (headroom on v7x)


def _gate_from_pooled(avg_p, max_p, w1t, w2):
    """sigmoid(W2 @ (relu(W1 @ avg) + relu(W1 @ max))), all f32.

    avg_p/max_p: (C, 1); w1t: (C, Ch) = fc[0].weight.T; w2: (C, Ch) = fc[2].weight.
    Equivalent to fc(avg) + fc(max) by linearity of W2. VPU/XLU only (no MXU).
    """
    h = (jnp.maximum(jnp.sum(w1t * avg_p, axis=0, keepdims=True), 0.0) +
         jnp.maximum(jnp.sum(w1t * max_p, axis=0, keepdims=True), 0.0))   # (1, Ch)
    logit = jnp.sum(w2 * h, axis=1, keepdims=True)                        # (C, 1)
    return jax.nn.sigmoid(logit)                                          # (C, 1) f32


# --------------------------------------------------------------------------
# Fused single-pass kernel: grid (N,), whole (C, HW) slab resident in VMEM.
# --------------------------------------------------------------------------
def _fused_kernel(x_ref, w1t_ref, w2_ref, o_ref, *, inv_hw):
    x = x_ref[0]                                          # (C, HW), input dtype
    xf = x.astype(jnp.float32)
    avg_p = jnp.sum(xf, axis=-1, keepdims=True) * inv_hw  # (C, 1)
    max_p = jnp.max(xf, axis=-1, keepdims=True)           # (C, 1)
    gate = _gate_from_pooled(avg_p, max_p, w1t_ref[...], w2_ref[...])
    o_ref[0] = (x * gate.astype(x_ref.dtype)).astype(o_ref.dtype)


# --------------------------------------------------------------------------
# Two-pass fallback.
# Pass 1: stream x, accumulate sum/max in VMEM scratch, emit gate at j==last.
# --------------------------------------------------------------------------
def _pool_gate_kernel(x_ref, w1t_ref, w2_ref, gate_ref, sum_sc, max_sc, *,
                      inv_hw, hw_true, hw_tile, padded):
    j = pl.program_id(1)
    xt = x_ref[0].astype(jnp.float32)                     # (C, hw_tile)
    xt_for_max = xt
    if padded:
        lane = jax.lax.broadcasted_iota(jnp.int32, xt.shape, 1)
        valid = (j * hw_tile + lane) < hw_true
        xt_for_max = jnp.where(valid, xt, -jnp.inf)       # zero pad is fine for sum
    part_sum = jnp.sum(xt, axis=-1, keepdims=True)        # (C, 1)
    part_max = jnp.max(xt_for_max, axis=-1, keepdims=True)

    @pl.when(j == 0)
    def _():
        sum_sc[...] = part_sum
        max_sc[...] = part_max

    @pl.when(j > 0)
    def _():
        sum_sc[...] = sum_sc[...] + part_sum
        max_sc[...] = jnp.maximum(max_sc[...], part_max)

    @pl.when(j == pl.num_programs(1) - 1)
    def _():
        gate = _gate_from_pooled(sum_sc[...] * inv_hw, max_sc[...],
                                 w1t_ref[...], w2_ref[...])
        gate_ref[0] = gate.astype(gate_ref.dtype)


# Pass 2: pure lane-dense scale stream (gate precomputed, input dtype math).
def _scale_kernel(gate_ref, x_ref, o_ref):
    o_ref[0] = (x_ref[0] * gate_ref[0]).astype(o_ref.dtype)


def _pick_hw_tile(hw_pad, c, itemsize, max_hw_tile=None):
    """Largest 128-multiple divisor of hw_pad s.t. pass-2 working set
    (~4 * C * tile * itemsize, double-buffered in + out) fits the budget."""
    max_tile = max(128, (_VMEM_WORKSET_BUDGET // (4 * c * itemsize)) // 128 * 128)
    if max_hw_tile is not None:
        max_tile = min(max_tile, max(128, (max_hw_tile // 128) * 128))
    max_tile = min(max_tile, hw_pad)
    best = 128
    t = 128
    while t <= max_tile:
        if hw_pad % t == 0:
            best = t
        t += 128
    return best


def channel_attention(x_nchw, w1, w2, *, force_two_pass=False, max_hw_tile=None):
    """CBAM ChannelAttention forward.

    x_nchw: (N, C, H, W)
    w1: (C // 16, C)   fc[0] = Conv2d(C, C//16, 1, bias=False) weight (squeezed)
    w2: (C, C // 16)   fc[2] = Conv2d(C//16, C, 1, bias=False) weight (squeezed)
    returns x * sigmoid(fc(avgpool(x)) + fc(maxpool(x)))   -> (N, C, H, W)
    """
    N, C, H, W = x_nchw.shape
    Ch = w1.shape[0]
    assert w1.shape == (Ch, C) and w2.shape == (C, Ch)
    HW = H * W
    itemsize = jnp.dtype(x_nchw.dtype).itemsize
    x3 = x_nchw.reshape(N, C, HW)                 # free view: no transpose/copy

    w1t = jnp.transpose(w1).astype(jnp.float32)   # (C, Ch) — tiny
    w2f = w2.astype(jnp.float32)                  # (C, Ch)

    # ---- fused single-pass path: per-batch slab resident in VMEM -----------
    fused_workset = 4 * C * HW * itemsize + 2 * C * Ch * 4
    if not force_two_pass and fused_workset <= _VMEM_WORKSET_BUDGET:
        out3 = pl.pallas_call(
            functools.partial(_fused_kernel, inv_hw=1.0 / HW),
            out_shape=jax.ShapeDtypeStruct((N, C, HW), x_nchw.dtype),
            grid_spec=pltpu.PrefetchScalarGridSpec(
                num_scalar_prefetch=0,
                grid=(N,),
                in_specs=[pl.BlockSpec((1, C, HW), lambda n: (n, 0, 0)),
                          pl.BlockSpec((C, Ch), lambda n: (0, 0)),
                          pl.BlockSpec((C, Ch), lambda n: (0, 0))],
                out_specs=pl.BlockSpec((1, C, HW), lambda n: (n, 0, 0))),
            compiler_params=pltpu.CompilerParams(
                dimension_semantics=("parallel",),
                vmem_limit_bytes=_VMEM_LIMIT_BYTES),
        )(x3, w1t, w2f)
        return out3.reshape(N, C, H, W)

    # ---- two-pass streaming fallback ---------------------------------------
    hw_pad = -(-HW // 128) * 128
    padded = hw_pad != HW
    x3p = jnp.pad(x3, ((0, 0), (0, 0), (0, hw_pad - HW))) if padded else x3

    hw_tile = _pick_hw_tile(hw_pad, C, itemsize, max_hw_tile)
    n_hw = hw_pad // hw_tile
    grid = (N, n_hw)

    # pass 1: pooling + gate (gate emitted once per (n, C) in the epilogue)
    gate = pl.pallas_call(
        functools.partial(_pool_gate_kernel, inv_hw=1.0 / HW, hw_true=HW,
                          hw_tile=hw_tile, padded=padded),
        out_shape=jax.ShapeDtypeStruct((N, C, 1), x_nchw.dtype),
        grid_spec=pltpu.PrefetchScalarGridSpec(
            num_scalar_prefetch=0,
            grid=grid,
            in_specs=[pl.BlockSpec((1, C, hw_tile), lambda n, j: (n, 0, j)),
                      pl.BlockSpec((C, Ch), lambda n, j: (0, 0)),
                      pl.BlockSpec((C, Ch), lambda n, j: (0, 0))],
            out_specs=pl.BlockSpec((1, C, 1), lambda n, j: (n, 0, 0)),
            scratch_shapes=[pltpu.VMEM((C, 1), jnp.float32),
                            pltpu.VMEM((C, 1), jnp.float32)]),
        compiler_params=pltpu.CompilerParams(
            dimension_semantics=("parallel", "arbitrary"),
            vmem_limit_bytes=_VMEM_LIMIT_BYTES),
    )(x3p, w1t, w2f)

    # pass 2: y = x * gate, pure HBM-roofline stream in the input dtype
    out3 = pl.pallas_call(
        _scale_kernel,
        out_shape=jax.ShapeDtypeStruct((N, C, hw_pad), x_nchw.dtype),
        grid_spec=pltpu.PrefetchScalarGridSpec(
            num_scalar_prefetch=0,
            grid=grid,
            in_specs=[pl.BlockSpec((1, C, 1), lambda n, j: (n, 0, 0)),
                      pl.BlockSpec((1, C, hw_tile), lambda n, j: (n, 0, j))],
            out_specs=pl.BlockSpec((1, C, hw_tile), lambda n, j: (n, 0, j))),
        compiler_params=pltpu.CompilerParams(
            dimension_semantics=("parallel", "parallel"),
            vmem_limit_bytes=_VMEM_LIMIT_BYTES),
    )(gate, x3p)

    if padded:
        out3 = out3[:, :, :HW]
    return out3.reshape(N, C, H, W)


if __name__ == "__main__":
    key = jax.random.PRNGKey(0)
    kx, k1, k2, kx2 = jax.random.split(key, 4)

    # in_planes must be >= 16 because the module hardcodes hidden = in_planes // 16.
    N, C = 2, 32
    Ch = C // 16

    w1 = jax.random.normal(k1, (Ch, C), dtype=jnp.float32) * 0.1   # fc[0].weight
    w2 = jax.random.normal(k2, (C, Ch), dtype=jnp.float32) * 0.1   # fc[2].weight

    def reference(x):
        avg = jnp.mean(x, axis=(2, 3))                    # (N, C)
        mx = jnp.max(x, axis=(2, 3))                      # (N, C)
        fc = lambda p: jnp.maximum(p @ w1.T, 0.0) @ w2.T  # shared MLP, no bias
        g = jax.nn.sigmoid(fc(avg) + fc(mx))              # (N, C)
        return x * g[:, :, None, None]

    ok = True

    # 1) fused single-pass path (slab fits VMEM).
    x = jax.random.normal(kx, (N, C, 16, 16), dtype=jnp.float32)
    y = jax.block_until_ready(channel_attention(x, w1, w2))
    assert y.shape == x.shape
    ok &= bool(jnp.allclose(y, reference(x), atol=1e-5, rtol=1e-5))

    # 2) two-pass streaming fallback, multiple HW tiles.
    y = jax.block_until_ready(
        channel_attention(x, w1, w2, force_two_pass=True, max_hw_tile=128))
    ok &= bool(jnp.allclose(y, reference(x), atol=1e-5, rtol=1e-5))

    # 3) two-pass fallback with HW not a multiple of 128 (padded + masked max).
    x2 = jax.random.normal(kx2, (N, C, 20, 20), dtype=jnp.float32)
    y2 = jax.block_until_ready(
        channel_attention(x2, w1, w2, force_two_pass=True, max_hw_tile=256))
    assert y2.shape == x2.shape
    ok &= bool(jnp.allclose(y2, reference(x2), atol=1e-5, rtol=1e-5))

    assert ok
    print("KERNEL_OK")
</pallas_src>

<mosaic_0001>
module attributes {stable_mosaic.version = 11 : i64} {
  func.func @_fused_kernel(%arg0: i32, %arg1: memref<1x32x256xf32, #tpu.memory_space<vmem>>, %arg2: memref<32x2xf32, #tpu.memory_space<vmem>>, %arg3: memref<32x2xf32, #tpu.memory_space<vmem>>, %arg4: memref<1x32x256xf32, #tpu.memory_space<vmem>>) attributes {dimension_semantics = [#tpu.dimension_semantics<parallel>], iteration_bounds = array<i64: 2>, scalar_prefetch = 0 : i64, scratch_operands = 0 : i64, tpu.core_type = #tpu.core_type<tc>, window_params = [{transform_indices = @transform_0, window_bounds = array<i64: 1, 32, 256>}, {pipeline_mode = #tpu.pipeline_mode<synchronous>, transform_indices = @transform_1, window_bounds = array<i64: 32, 2>}, {pipeline_mode = #tpu.pipeline_mode<synchronous>, transform_indices = @transform_2, window_bounds = array<i64: 32, 2>}, {transform_indices = @transform_3, window_bounds = array<i64: 1, 32, 256>}]} {
    %c0 = arith.constant 0 : index
    %c0_0 = arith.constant 0 : index
    %c0_1 = arith.constant 0 : index
    %0 = vector.load %arg1[%c0, %c0_0, %c0_1] : memref<1x32x256xf32, #tpu.memory_space<vmem>>, vector<1x32x256xf32>
    %1 = vector.shape_cast %0 : vector<1x32x256xf32> to vector<32x256xf32>
    %cst = arith.constant dense<0.000000e+00> : vector<32xf32>
    %2 = vector.multi_reduction <add>, %1, %cst [1] : vector<32x256xf32> to vector<32xf32>
    %3 = vector.shape_cast %2 : vector<32xf32> to vector<32x1xf32>
    %cst_2 = arith.constant 3.906250e-03 : f32
    %4 = vector.broadcast %cst_2 : f32 to vector<32x1xf32>
    %5 = arith.mulf %3, %4 : vector<32x1xf32>
    %cst_3 = arith.constant dense<0xFF800000> : vector<32xf32>
    %6 = vector.multi_reduction <maximumf>, %1, %cst_3 [1] : vector<32x256xf32> to vector<32xf32>
    %7 = vector.shape_cast %6 : vector<32xf32> to vector<32x1xf32>
    %c0_4 = arith.constant 0 : index
    %c0_5 = arith.constant 0 : index
    %8 = vector.load %arg2[%c0_4, %c0_5] : memref<32x2xf32, #tpu.memory_space<vmem>>, vector<32x2xf32>
    %c0_6 = arith.constant 0 : index
    %c0_7 = arith.constant 0 : index
    %9 = vector.load %arg3[%c0_6, %c0_7] : memref<32x2xf32, #tpu.memory_space<vmem>>, vector<32x2xf32>
    %10 = vector.broadcast %5 : vector<32x1xf32> to vector<32x2xf32>
    %11 = arith.mulf %8, %10 : vector<32x2xf32>
    %cst_8 = arith.constant dense<0.000000e+00> : vector<2xf32>
    %12 = vector.multi_reduction <add>, %11, %cst_8 [0] : vector<32x2xf32> to vector<2xf32>
    %13 = vector.shape_cast %12 : vector<2xf32> to vector<1x2xf32>
    %cst_9 = arith.constant 0.000000e+00 : f32
    %14 = vector.broadcast %cst_9 : f32 to vector<1x2xf32>
    %15 = arith.maximumf %13, %14 : vector<1x2xf32>
    %16 = vector.broadcast %7 : vector<32x1xf32> to vector<32x2xf32>
    %17 = arith.mulf %8, %16 : vector<32x2xf32>
    %cst_10 = arith.constant dense<0.000000e+00> : vector<2xf32>
    %18 = vector.multi_reduction <add>, %17, %cst_10 [0] : vector<32x2xf32> to vector<2xf32>
    %19 = vector.shape_cast %18 : vector<2xf32> to vector<1x2xf32>
    %cst_11 = arith.constant 0.000000e+00 : f32
    %20 = vector.broadcast %cst_11 : f32 to vector<1x2xf32>
    %21 = arith.maximumf %19, %20 : vector<1x2xf32>
    %22 = arith.addf %15, %21 : vector<1x2xf32>
    %23 = vector.broadcast %22 : vector<1x2xf32> to vector<32x2xf32>
    %24 = arith.mulf %9, %23 : vector<32x2xf32>
    %cst_12 = arith.constant dense<0.000000e+00> : vector<32xf32>
    %25 = vector.multi_reduction <add>, %24, %cst_12 [1] : vector<32x2xf32> to vector<32xf32>
    %26 = vector.shape_cast %25 : vector<32xf32> to vector<32x1xf32>
    %27 = arith.negf %26 : vector<32x1xf32>
    %28 = math.exp %27 : vector<32x1xf32>
    %cst_13 = arith.constant 1.000000e+00 : f32
    %29 = vector.broadcast %cst_13 : f32 to vector<32x1xf32>
    %30 = arith.addf %29, %28 : vector<32x1xf32>
    %31 = arith.divf %29, %30 : vector<32x1xf32>
    %32 = vector.broadcast %31 : vector<32x1xf32> to vector<32x256xf32>
    %33 = arith.mulf %1, %32 : vector<32x256xf32>
    %c0_14 = arith.constant 0 : index
    %c0_15 = arith.constant 0 : index
    %c0_16 = arith.constant 0 : index
    %34 = vector.load %arg4[%c0_14, %c0_15, %c0_16] : memref<1x32x256xf32, #tpu.memory_space<vmem>>, vector<1x32x256xf32>
    %35 = vector.shape_cast %34 : vector<1x32x256xf32> to vector<32x256xf32>
    %36 = vector.shape_cast %33 : vector<32x256xf32> to vector<1x32x256xf32>
    tpu.vector_store %arg4[%c0_14, %c0_15, %c0_16], %36 {strides = array<i32>} : memref<1x32x256xf32, #tpu.memory_space<vmem>>, vector<1x32x256xf32>,
    return
  }
  func.func @transform_0(%arg0: i32) -> (i32, i32, i32) {
    %c0_i32 = arith.constant 0 : i32
    %c0_i32_0 = arith.constant 0 : i32
    %c0_i32_1 = arith.constant 0 : i32
    return %arg0, %c0_i32, %c0_i32_0 : i32, i32, i32
  }
  func.func @transform_1(%arg0: i32) -> (i32, i32) {
    %c0_i32 = arith.constant 0 : i32
    %c0_i32_0 = arith.constant 0 : i32
    %c0_i32_1 = arith.constant 0 : i32
    return %c0_i32, %c0_i32_0 : i32, i32
  }
  func.func @transform_2(%arg0: i32) -> (i32, i32) {
    %c0_i32 = arith.constant 0 : i32
    %c0_i32_0 = arith.constant 0 : i32
    %c0_i32_1 = arith.constant 0 : i32
    return %c0_i32, %c0_i32_0 : i32, i32
  }
  func.func @transform_3(%arg0: i32) -> (i32, i32, i32) {
    %c0_i32 = arith.constant 0 : i32
    %c0_i32_0 = arith.constant 0 : i32
    %c0_i32_1 = arith.constant 0 : i32
    return %arg0, %c0_i32, %c0_i32_0 : i32, i32, i32
  }
}

</mosaic_0001>

<bundles_post_ra>
// kernel: tpu_custom_call.1
= control target key start
LH: loop header
LB: loop body
LE: loop exit
PB: predicated region body
PF: predicated region fallthrough
CT: control target
= control target key end

     0   :  { %8 = vsyncpa [#allocation3], 0  ;;  %s854_s0 = inlined_call_operand.hbm [shape: f32[2,32,256], index: 0, kind: input, shape index: {}]   ;;  %s855_s1 = inlined_call_operand.vmem [shape: f32[32,2], index: 1, kind: input, shape index: {}]   ;;  %s856_s2 = inlined_call_operand.vmem [shape: f32[32,2], index: 2, kind: input, shape index: {}]   ;;  %s857_s3 = inlined_call_operand.hbm [shape: f32[2,32,256], index: 3, kind: output, shape index: {}]  }
   0x1   :  { %10 = vsyncpa [#allocation3 + $0x1], 0 }
   0x2   :  { %11 = vsyncpa [#allocation4], 0 }
   0x3   :  { %13 = vsyncpa [#allocation4 + $0x1], 0  ;;  %s620_s12 = smov 0   ;;  %s622_s13 = smov 0  }
   0x4   :  { %s624_s14 = smov 0   ;;  %s626_s15 = smov 0  }
   0x5 LB: > { %s641_s16 = sadd.s32 4294967295, %s592_s15   ;;  %s414_s17 = sadd.s32 4294967294, %s592_s15   ;;  %s592_s15 = sphi %s626_s15, %s872_s15   ;;  %s588_s14 = sphi %s624_s14, %s871_s14   ;;  %s584_s13 = sphi %s622_s13, %s870_s13   ;;  %s580_s12 = sphi %s620_s12, %s869_s12  }
   0x6   : > { %s645_s18 = sadd.s32 1, %s592_s15   ;;  %s26_s19 = sadd.s32 1, %s588_s14 }
   0x7   : > { %s23_s20 = ssub.s32 %s592_s15, %s645_s18  ;;  %p33_p0 = scmp.ne.s32.totalorder %s588_s14, %s584_s13 }
   0x8   : > { %p24_p1 = scmp.eq.s32.totalorder %s23_s20, 0  ;;  %p34_p2 = scmp.eq.s32.totalorder %s592_s15, 0 }
   0x9   : > { %p39_p3 = scmp.ne.s32.totalorder %s584_s13, %s580_s12  ;;  %p40_p4 = scmp.eq.s32.totalorder %s641_s16, 0 }
   0xa   : > { %s657_s21 = scalar_select %p24_p1, %s588_s14, %s26_s19  }
   0xb   : > { %p659_p5 = por %p34_p2, %p33_p0  ;;  %p663_p6 = por %p40_p4, %p39_p3 }
   0xc   : > { %p105_p7 = scmp.eq.s32.totalorder %s641_s16, 1  ;;  %p111_p8 = scmp.eq.s32.totalorder %s414_s17, 1 }
   0xd   : > { %s861_s23 = scalar_select %p663_p6, 1, 0 }
   0xe   : > { %p446_p10 = scmp.lt.s32.totalorder %s592_s15, 2  ;;  %p670_p11 = por %p105_p7, %p33_p0 }
   0xf   : > { %p674_p12 = por %p111_p8, %p39_p3  ;;  %s137_s26 = sand.u32 1, %s588_s14  }
  0x10   : > { %s862_s24 = scalar_select %p670_p11, 1, 0 }
  0x11   : > { %s863_s25 = scalar_select %p674_p12, 1, 0 }
  0x12   : > { %s432_s27 = sshll.u32 %s592_s15, 10  ;;  %s417_s28 = sshll.u32 %s137_s26, 6 }
  0x13   : > { %s683_s4 = scalar_lea.hbm %s854_s0, %s432_s27  ;;  %s141_s5 = scalar_lea.vmem [#allocation2], %s417_s28 }
  0x14   : > { %s148_s6 = sshll.u32 %s141_s5, 4  ;;  %p687_p13 = pnand %p446_p10, %p659_p5  ;;  %s691_s6 = int_to_ptr.vmem [resolvable:$true] %s148_s6 }
  0x15   : > { %s693_s8 = scalar_lea.sflag [#allocation3], %s137_s26  ;;  %s500_s9 = scalar_lea.hbm %s683_s4, 1024 }
  0x16   : > { %p501_p0 = scmp.ne.s32.totalorder %s683_s4, %s500_s9  ;;  %p502_p1 = pneg %p687_p13 }
  0x17   : > { %s505_s17 = scalar_lea.hbm %s854_s0, 2048  ;;  %p506_p4 = scmp.lt.s32.totalorder %s683_s4, %s854_s0 }
  0x18   : > { %p503_p2 = pnand %p502_p1, %p501_p0  ;;  %p507_p5 = scmp.lt.s32.totalorder %s505_s17, %s500_s9 }
  0x1a   : > { %p504_p3 = pneg %p503_p2  ;;  %p508_p7 = por %p507_p5, %p506_p4 }
  0x1c   : > { %p509_p8 = pnand %p508_p7, %p504_p3 }
  0x1e   : > { %512 = shalt.err (!%p509_p8)
}
  0x1f   : > { %s513_s22 = scalar_lea.vmem %s691_s6, 1024  ;;  %s594_s26 = smov [#allocation2]  }
  0x20   : > { %p514_p10 = scmp.ne.s32.totalorder %s691_s6, %s513_s22  ;;  %s518_s27 = sshll.u32 %s594_s26, 4  ;;  %s519_s27 = int_to_ptr.vmem [resolvable:$false] %s518_s27 }
  0x21   : > { %s520_s28 = scalar_lea.vmem %s519_s27, 2048  ;;  %p521_p2 = scmp.lt.s32.totalorder %s691_s6, %s519_s27 }
  0x22   : > { %p516_p9 = pnand %p514_p10, %p502_p1  ;;  %p522_p12 = scmp.lt.s32.totalorder %s520_s28, %s513_s22 }
  0x24   : > { %p517_p0 = pneg %p516_p9  ;;  %p523_p11 = por %p522_p12, %p521_p2 }
  0x26   : > { %p524_p6 = pnand %p523_p11, %p517_p0 }
  0x28   : > { %527 = shalt.err (!%p524_p6)
}
  0x29   : > { %s595_s29 = smov 256   ;;  %s596_s30 = smov 16  }
  0x2a   : > { %441 = dma.hbm_to_vmem [thread:$0]  (!%p687_p13), %s683_s4, 1024, %s691_s6, %s693_s8, %s595_s29, %s595_s29, %s596_s30  }
  0x2b   : > { %p420_p9 = scmp.ge.s32.totalorder %s592_s15, 1  ;;  %p156_p1 = scmp.lt.s32.totalorder %s592_s15, 3 }
  0x2d   : > { %p157_p3 = pnand %p420_p9, %p156_p1 }
  0x2e   : > { %s717_s5 = sand.u32 (!%p157_p3), 1, %s584_s13   ;;  %p865_p6 = scmp.ne.s32.totalorder (!%p157_p3), %s861_s23, 0 }
  0x2f   : > { %160 = sbr.rel (%p157_p3) target bundleno = 424 (0x1a8), region = 32  ;;  %s421_s9 = sshll.u32 (!%p157_p3), %s717_s5, 6 }
  0x30   : > { %s163_s10 = scalar_lea.sflag (!%p157_p3), [#allocation3], %s717_s5  ;;  %s166_s11 = scalar_lea.vmem (!%p157_p3), [#allocation2], %s421_s9 }
  0x34   : > { %571 = dma.done.wait (%p865_p6), %s163_s10, 1024  }
  0x35   : > { %573 = vsyncadd (%p865_p6), %s163_s10, 4294966272  ;;  %v727_v0 = vld [vmem:[%s166_s11 + $0x20] sm:$0xff]  ;;  %v729_v1 = vld [vmem:[%s166_s11 + $0x28] sm:$0xff]  ;;  %vm237_vm0 = vcmask 15360   ;;  %s433_s23 = sshll.u32 %s641_s16, 10  ;;  %s188_s4 = scalar_lea.vmem [#allocation5], %s421_s9 }
  0x36   : > { %v731_v2 = vld [vmem:[%s166_s11] sm:$0xff]  ;;  %v203_v3 = vadd.f32 %v729_v1, %v727_v0  ;;  %v735_v4 = vld [vmem:[%s166_s11 + $0x8] sm:$0xff]  ;;  %v737_v5 = vld [vmem:[%s166_s11 + $0x10] sm:$0xff]  ;;  %v219_v15 = vmax.f32 %v727_v0, %v729_v1  ;;  %s341_s6 = sshll.u32 %s188_s4, 4  ;;  %s807_s17 = scalar_lea.hbm %s857_s3, %s433_s23  ;;  %s809_s6 = int_to_ptr.vmem [resolvable:$true] %s341_s6 }
  0x37   : > { %v739_v6 = vld [vmem:[%s166_s11 + $0x18] sm:$0xff]  ;;  %v197_v7 = vadd.f32 %v735_v4, %v731_v2  ;;  %v213_v8 = vmax.f32 %v731_v2, %v735_v4  ;;  %v747_v10 = vld [vmem:[%s166_s11 + $0x30] sm:$0xff]  ;;  %v225_v19 = vld [vmem:[%s855_s1] sm:$0xff]  ;;  %s328_s16 = scalar_lea.sflag [#allocation4], %s717_s5  ;;  %s528_s9 = scalar_lea.vmem %s809_s6, 1024 }
  0x38   : > { %204 = vadd.xlane.f32.xlu1 %v203_v3  ;;  %v200_v9 = vadd.f32 %v739_v6, %v737_v5  ;;  %v749_v11 = vld [vmem:[%s166_s11 + $0x38] sm:$0xff]  ;;  %v216_v13 = vmax.f32 %v737_v5, %v739_v6  ;;  %v226_v23 = vld [vmem:[%s855_s1 + $0x8] sm:$0xff]  ;;  %v227_v24 = vld [vmem:[%s855_s1 + $0x10] sm:$0xff]  ;;  %p529_p11 = scmp.ne.s32.totalorder %s809_s6, %s528_s9  ;;  %p866_p12 = scmp.ne.s32.totalorder %s862_s24, 0 }
  0x39   : > { %198 = vadd.xlane.f32.xlu0 %v197_v7  ;;  %v206_v12 = vadd.f32 %v749_v11, %v747_v10  ;;  %v222_v14 = vmax.f32 %v747_v10, %v749_v11  ;;  %v228_v30 = vld [vmem:[%s855_s1 + $0x18] sm:$0xff]  ;;  %s597_s19 = smov [#allocation5]  }
  0x3a   : > { %p530_p13 = pnand %p529_p11, %p866_p12  ;;  %s532_s20 = sshll.u32 %s597_s19, 4  ;;  %s533_s20 = int_to_ptr.vmem [resolvable:$false] %s532_s20 }
  0x3b   : > { %s534_s22 = scalar_lea.vmem %s533_s20, 2048  ;;  %p535_p5 = scmp.lt.s32.totalorder %s809_s6, %s533_s20 }
  0x3c   : > { %214 = vmax.xlane.f32.xlu1 %v213_v8  ;;  %p531_p4 = pneg %p530_p13  ;;  %p536_p7 = scmp.lt.s32.totalorder %s534_s22, %s528_s9 }
  0x3d   : > { %201 = vadd.xlane.f32.xlu0 %v200_v9 }
  0x3e   : > { %p537_p8 = por %p536_p7, %p535_p5 }
  0x40   : > { %207 = vadd.xlane.f32.xlu1 %v206_v12  ;;  %v230_v12 = vld [vmem:[%s856_s2 + $0x8] sm:$0xff]  ;;  %p538_p10 = pnand %p537_p8, %p531_p4 }
  0x41   : > { %217 = vmax.xlane.f32.xlu0 %v216_v13  ;;  %v229_v13 = vld [vmem:[%s856_s2] sm:$0xff] }
  0x44   : > { %223 = vmax.xlane.f32.xlu1 %v222_v14 }
  0x45   : > { %220 = vmax.xlane.f32.xlu0 %v219_v15  ;;  %v232_v15 = vld [vmem:[%s856_s2 + $0x18] sm:$0xff] }
  0xc1   : > { %v205_v16 = vpop.xlane.xlu1 %204 }
  0xc2   : > { %v199_v17 = vpop.xlane.xlu0 %198  ;;  %v211_v20 = vmul.f32 0.00390625, %v205_v16  ;;  %v231_v16 = vld [vmem:[%s856_s2 + $0x10] sm:$0xff] }
  0xc3   : > { %v209_v18 = vmul.f32 0.00390625, %v199_v17 }
  0xc4   : > { %v235_v29 = vmul.f32 %v227_v24, %v211_v20 }
  0xc5   : > { %v215_v21 = vpop.xlane.xlu1 %214  ;;  %v233_v25 = vmul.f32 %v225_v19, %v209_v18 }
  0xc6   : > { %v202_v22 = vpop.xlane.xlu0 %201  ;;  %v252_v34 = vmul.f32 %v225_v19, %v215_v21  ;;  %v241_v40 = vsel %vm237_vm0, %v235_v29, 0.0 }
  0xc7   : > { %v210_v26 = vmul.f32 0.00390625, %v202_v22  ;;  %v238_v33 = vsel %vm237_vm0, %v233_v25, 0.0 }
  0xc8   : > { %v256_v46 = vsel %vm237_vm0, %v252_v34, 0.0 }
  0xc9   : > { %v208_v27 = vpop.xlane.xlu1 %207  ;;  %v234_v28 = vmul.f32 %v226_v23, %v210_v26 }
  0xca   : > { %v212_v31 = vmul.f32 0.00390625, %v208_v27  ;;  %v218_v32 = vpop.xlane.xlu0 %217 }
  0xcb   : > { %v239_v35 = vsel %vm237_vm0, %v234_v28, 0.0  ;;  %v253_v36 = vmul.f32 %v226_v23, %v218_v32 }
  0xcc   : > { %v240_v37 = vadd.f32 %v239_v35, %v238_v33  ;;  %v236_v38 = vmul.f32 %v228_v30, %v212_v31 }
  0xcd   : > { %v257_v39 = vsel %vm237_vm0, %v253_v36, 0.0  ;;  %v224_v41 = vpop.xlane.xlu1 %223 }
  0xce   : > { %v242_v42 = vadd.f32 %v241_v40, %v240_v37  ;;  %v221_v43 = vpop.xlane.xlu0 %220  ;;  %v243_v44 = vsel %vm237_vm0, %v236_v38, 0.0  ;;  %v255_v45 = vmul.f32 %v228_v30, %v224_v41  ;;  %v258_v48 = vadd.f32 %v257_v39, %v256_v46 }
  0xcf   : > { %v254_v47 = vmul.f32 %v227_v24, %v221_v43 }
  0xd0   : > { %v244_v49 = vadd.f32 %v243_v44, %v242_v42  ;;  %v261_v51 = vsel %vm237_vm0, %v255_v45, 0.0 }
  0xd1   : > { %v259_v50 = vsel %vm237_vm0, %v254_v47, 0.0 }
  0xd2   : > { %v260_v52 = vadd.f32 %v259_v50, %v258_v48  ;;  %v245_v53 = vrot.slane %v244_v49, 4 }
  0xd4   : > { %v246_v54 = vadd.f32 %v245_v53, %v244_v49  ;;  %v262_v55 = vadd.f32 %v261_v51, %v260_v52 }
  0xd6   : > { %v247_v56 = vrot.slane %v246_v54, 2  ;;  %v263_v57 = vrot.slane %v262_v55, 4 }
  0xd8   : > { %v248_v58 = vadd.f32 %v247_v56, %v246_v54  ;;  %v264_v59 = vadd.f32 %v263_v57, %v262_v55 }
  0xda   : > { %v249_v60 = vrot.slane %v248_v58, 1  ;;  %v265_v61 = vrot.slane %v264_v59, 2 }
  0xdc   : > { %v266_v62 = vadd.f32 %v265_v61, %v264_v59  ;;  %v250_v63 = vadd.f32 %v249_v60, %v248_v58 }
  0xde   : > { %v267_v3 = vrot.slane %v266_v62, 1  ;;  %v251_v8 = vmax.f32 %v250_v63, 0.0 }
  0xe0   : > { %v268_v7 = vadd.f32 %v267_v3, %v266_v62 }
  0xe2   : > { %v269_v9 = vmax.f32 %v268_v7, 0.0 }
  0xe4   : > { %v270_v14 = vadd.f32 %v269_v9, %v251_v8 }
  0xe6   : > { %v272_v17 = vmul.f32 %v270_v14, %v230_v12  ;;  %v271_v18 = vmul.f32 %v270_v14, %v229_v13  ;;  %v274_v21 = vmul.f32 %v270_v14, %v232_v15  ;;  %v273_v22 = vmul.f32 %v270_v14, %v231_v16 }
  0xe8   : > { %v278_v19 = vsel %vm237_vm0, %v272_v17, 0.0  ;;  %v275_v20 = vsel %vm237_vm0, %v271_v18, 0.0  ;;  %v284_v23 = vsel %vm237_vm0, %v274_v21, 0.0  ;;  %v281_v24 = vsel %vm237_vm0, %v273_v22, 0.0 }
  0xe9   : > { %279 = vadd.xlane.f32.xlu1 %v278_v19  ;;  %276 = vadd.xlane.f32.xlu0 %v275_v20 }
  0xed   : > { %285 = vadd.xlane.f32.xlu1 %v284_v23  ;;  %282 = vadd.xlane.f32.xlu0 %v281_v24 }
 0x172   : > { %v280_v25 = vpop.xlane.xlu1 %279  ;;  %v277_v26 = vpop.xlane.xlu0 %276 }
 0x173   : > { %v424_v27 = vmul.f32 -1.442695, %v280_v25  ;;  %v423_v28 = vmul.f32 -1.442695, %v277_v26 }
 0x175   : > { %484 = vpow2.f32 %v424_v27 }
 0x176   : > { %486 = vpow2.f32 %v423_v28  ;;  %v286_v29 = vpop.xlane.xlu1 %285  ;;  %v283_v30 = vpop.xlane.xlu0 %282 }
 0x177   : > { %v426_v31 = vmul.f32 -1.442695, %v286_v29  ;;  %v425_v32 = vmul.f32 -1.442695, %v283_v30 }
 0x179   : > { %488 = vpow2.f32 %v426_v31 }
 0x17a   : > { %490 = vpow2.f32 %v425_v32 }
 0x182   : > { %v485_v33 = vpop.eup %484 }
 0x183   : > { %v487_v34 = vpop.eup %486  ;;  %v300_v35 = vadd.f32 1.0, %v485_v33 }
 0x184   : > { %v299_v36 = vadd.f32 1.0, %v487_v34 }
 0x185   : > { %492 = vrcp.f32 %v300_v35 }
 0x186   : > { %v489_v37 = vpop.eup %488  ;;  %494 = vrcp.f32 %v299_v36 }
 0x187   : > { %v491_v38 = vpop.eup %490  ;;  %v302_v39 = vadd.f32 1.0, %v489_v37 }
 0x188   : > { %v301_v40 = vadd.f32 1.0, %v491_v38 }
 0x189   : > { %496 = vrcp.f32 %v302_v39 }
 0x18a   : > { %498 = vrcp.f32 %v301_v40 }
 0x192   : > { %v493_v41 = vpop.eup %492 }
 0x193   : > { %v495_v42 = vpop.eup %494  ;;  %v313_v43 = vmul.f32 %v493_v41, %v737_v5  ;;  %v314_v44 = vmul.f32 %v493_v41, %v739_v6 }
 0x194   : > { %v311_v45 = vmul.f32 %v495_v42, %v731_v2  ;;  %v312_v46 = vmul.f32 %v495_v42, %v735_v4 }
 0x195   : > { %321 = vst [vmem:[%s188_s4 + $0x10] sm:$0xff] %v313_v43  ;;  %322 = vst [vmem:[%s188_s4 + $0x18] sm:$0xff] %v314_v44 }
 0x196   : > { %v497_v47 = vpop.eup %496  ;;  %319 = vst [vmem:[%s188_s4] sm:$0xff] %v311_v45  ;;  %320 = vst [vmem:[%s188_s4 + $0x8] sm:$0xff] %v312_v46 }
 0x197   : > { %v499_v48 = vpop.eup %498  ;;  %v317_v5 = vmul.f32 %v497_v47, %v747_v10  ;;  %v318_v6 = vmul.f32 %v497_v47, %v749_v11 }
 0x198   : > { %v315_v2 = vmul.f32 %v499_v48, %v727_v0  ;;  %v316_v4 = vmul.f32 %v499_v48, %v729_v1 }
 0x199   : > { %325 = vst [vmem:[%s188_s4 + $0x30] sm:$0xff] %v317_v5  ;;  %326 = vst [vmem:[%s188_s4 + $0x38] sm:$0xff] %v318_v6 }
 0x19a   : > { %323 = vst [vmem:[%s188_s4 + $0x20] sm:$0xff] %v315_v2  ;;  %324 = vst [vmem:[%s188_s4 + $0x28] sm:$0xff] %v316_v4 }
 0x19b   : > { %541 = shalt.err (!%p538_p10)
}
 0x19c   : > { %s542_s26 = scalar_lea.hbm %s807_s17, 1024  ;;  %s546_s29 = scalar_lea.hbm %s857_s3, 2048 }
 0x19d   : > { %p543_p0 = scmp.ne.s32.totalorder %s807_s17, %s542_s26  ;;  %p547_p1 = scmp.lt.s32.totalorder %s807_s17, %s857_s3 }
 0x19e   : > { %p548_p3 = scmp.lt.s32.totalorder %s546_s29, %s542_s26 }
 0x19f   : > { %p544_p2 = pnand %p543_p0, %p866_p12 }
 0x1a0   : > { %p549_p6 = por %p548_p3, %p547_p1 }
 0x1a1   : > { %p545_p9 = pneg %p544_p2 }
 0x1a3   : > { %p550_p11 = pnand %p549_p6, %p545_p9 }
 0x1a5   : > { %553 = shalt.err (!%p550_p11)
}
 0x1a6   : > { %s598_s11 = smov 256   ;;  %s599_s23 = smov 16  }
 0x1a7   : > { %436 = dma.vmem_to_hbm [thread:$0]  (%p866_p12), %s809_s6, 1024, %s807_s17, %s328_s16, %s598_s11, %s598_s11, %s599_s23  }
 0x1a8 PF: > { %s356_s4 = sand.u32 1, %s580_s12   ;;  %p867_p13 = scmp.ne.s32.totalorder %s863_s25, 0 }
 0x1a9   : > { %p868_p4 = scmp.ge.s32.totalorder %s592_s15, 2  ;;  %s357_s7 = scalar_lea.sflag [#allocation4], %s356_s4 }
 0x1ab   : > { %p443_p5 = pnand %p868_p4, %p867_p13 }
 0x1ad   : > { %p444_p7 = pneg %p443_p5 }
 0x1af   : > { %575 = dma.done.wait (%p444_p7), %s357_s7, 1024  }
 0x1b0   : > { %577 = vsyncadd (%p444_p7), %s357_s7, 4294966272  ;;  %p16_p8 = scmp.ge.s32.totalorder %s645_s18, 4   ;;  %s869_s12 = smov %s584_s13 }
 0x1b1   : > { %s870_s13 = smov %s588_s14  ;;  %s871_s14 = smov %s657_s21 }
 0x1b2   : > { %s872_s15 = smov %s645_s18  ;;  %18 = sbr.rel (!%p16_p8) target bundleno = 5 (0x5), region = 77 }
 0x1b7   :  { %362 = vsyncpa [#allocation3], 1 }
 0x1b8   :  { %364 = vsyncpa [#allocation3 + $0x1], 1 }
 0x1b9   :  { %365 = vsyncpa [#allocation4], 1 }
 0x1ba   :  { %367 = vsyncpa [#allocation4 + $0x1], 1 }

</bundles_post_ra>
